<compile_context>
chip_gen: v6e
topology: v6e:2x2x1
jax: 0.10.0
libtpu: 0.0.40
codegen_flags: <defaults>
</compile_context>

<pallas_src>
import functools

import jax
import jax.numpy as jnp
from jax.experimental import pallas as pl
from jax.experimental.pallas import tpu as pltpu

LANE = 128                 # padded channel width (lane-dense layout)
ACT_DTYPE = jnp.bfloat16   # activation storage dtype between kernels


def _round_up(n, m):
    return ((n + m - 1) // m) * m


def _pad_last(x, target):
    c = x.shape[-1]
    if c == target:
        return x
    pad = [(0, 0)] * (x.ndim - 1) + [(0, target - c)]
    return jnp.pad(x, pad)


# --------------------------- 3x3 conv kernels (no im2col) ---------------------------

def _row_map(ky, H, s):
    """Index map selecting input row  s*h + ky - 1  (clamped; masked in-kernel)."""
    def m(b, h):
        return (b, jnp.clip(s * h + ky - 1, 0, H - 1), 0, 0)
    return m


def _conv3x3_s1_kernel(xm_ref, xc_ref, xp_ref, w_ref, b_ref, s_ref, t_ref,
                       y_ref, st_ref, *, H, act):
    ho = pl.program_id(1)
    W = y_ref.shape[2]
    N = y_ref.shape[3]
    scale = s_ref[...].astype(jnp.float32)           # (1, cin) folded input-BN affine
    shift = t_ref[...].astype(jnp.float32)
    rows = (xm_ref[0, 0], xc_ref[0, 0], xp_ref[0, 0])  # (W, cin) bf16 rows h-1, h, h+1

    acc = jnp.zeros((W, N), jnp.float32)
    zero_row = jnp.zeros((1, N), jnp.float32)
    for ky in range(3):
        r = (rows[ky].astype(jnp.float32) * scale + shift).astype(ACT_DTYPE)
        ri = ho + ky - 1
        m = jnp.logical_and(ri >= 0, ri <= H - 1).astype(jnp.float32)
        c1 = jnp.dot(r, w_ref[ky, 1], preferred_element_type=jnp.float32)
        t0 = jnp.dot(r, w_ref[ky, 0], preferred_element_type=jnp.float32)
        t2 = jnp.dot(r, w_ref[ky, 2], preferred_element_type=jnp.float32)
        c0 = jnp.concatenate([zero_row, t0[:W - 1]], axis=0)   # out[w] += x[w-1] @ w0
        c2 = jnp.concatenate([t2[1:], zero_row], axis=0)        # out[w] += x[w+1] @ w2
        acc = acc + m * (c0 + c1 + c2)

    acc = acc + b_ref[...].astype(jnp.float32)
    if act == "relu":
        acc = jnp.maximum(acc, 0.0)
    y_ref[0, 0] = acc.astype(y_ref.dtype)
    st_ref[0, 0] = jnp.concatenate(
        [jnp.sum(acc, axis=0, keepdims=True),
         jnp.sum(acc * acc, axis=0, keepdims=True)], axis=0)


def _conv3x3_s2_kernel(xem_ref, xec_ref, xep_ref, xom_ref, xoc_ref, xop_ref,
                       w_ref, b_ref, s_ref, t_ref, y_ref, st_ref, *, H, act):
    ho = pl.program_id(1)
    Wo = y_ref.shape[2]
    N = y_ref.shape[3]
    scale = s_ref[...].astype(jnp.float32)
    shift = t_ref[...].astype(jnp.float32)
    rows_e = (xem_ref[0, 0], xec_ref[0, 0], xep_ref[0, 0])   # even input cols
    rows_o = (xom_ref[0, 0], xoc_ref[0, 0], xop_ref[0, 0])   # odd  input cols

    acc = jnp.zeros((Wo, N), jnp.float32)
    zero_row = jnp.zeros((1, N), jnp.float32)
    for ky in range(3):
        re = (rows_e[ky].astype(jnp.float32) * scale + shift).astype(ACT_DTYPE)
        ro = (rows_o[ky].astype(jnp.float32) * scale + shift).astype(ACT_DTYPE)
        ri = 2 * ho + ky - 1
        m = jnp.logical_and(ri >= 0, ri <= H - 1).astype(jnp.float32)
        c1 = jnp.dot(re, w_ref[ky, 1], preferred_element_type=jnp.float32)  # col 2w
        c2 = jnp.dot(ro, w_ref[ky, 2], preferred_element_type=jnp.float32)  # col 2w+1
        t0 = jnp.dot(ro, w_ref[ky, 0], preferred_element_type=jnp.float32)  # col 2w-1
        c0 = jnp.concatenate([zero_row, t0[:Wo - 1]], axis=0)
        acc = acc + m * (c0 + c1 + c2)

    acc = acc + b_ref[...].astype(jnp.float32)
    if act == "relu":
        acc = jnp.maximum(acc, 0.0)
    y_ref[0, 0] = acc.astype(y_ref.dtype)
    st_ref[0, 0] = jnp.concatenate(
        [jnp.sum(acc, axis=0, keepdims=True),
         jnp.sum(acc * acc, axis=0, keepdims=True)], axis=0)


def conv3x3(x, w, bias, in_scale, in_shift, *, stride, act):
    """3x3 conv, pad=1.  x: (B,H,W,cin) bf16, w: (3,3,cin,N).  A per-channel affine
    (the pending BatchNorm of the producer) is applied to the input inside the kernel.
    Returns (y (B,Ho,Wo,N) bf16,  stats (2,N) f32 = per-channel [sum, sum_sq] of y)."""
    B, H, W, cin = x.shape
    N = w.shape[-1]
    assert W >= 2
    wb = w.astype(ACT_DTYPE)
    b2 = bias.reshape(1, N).astype(jnp.float32)
    s2 = in_scale.reshape(1, cin).astype(jnp.float32)
    t2 = in_shift.reshape(1, cin).astype(jnp.float32)

    if stride == 1:
        Ho, Wo = H, W
        in_specs = [pl.BlockSpec((1, 1, W, cin), _row_map(ky, H, 1)) for ky in range(3)]
        kernel = functools.partial(_conv3x3_s1_kernel, H=H, act=act)
        x_args = (x, x, x)
    else:
        assert stride == 2 and H % 2 == 0 and W % 2 == 0, "stride-2 conv needs even H, W"
        Ho, Wo = H // 2, W // 2
        xe = x[:, :, 0::2, :]
        xo = x[:, :, 1::2, :]
        in_specs = ([pl.BlockSpec((1, 1, Wo, cin), _row_map(ky, H, 2)) for ky in range(3)] +
                    [pl.BlockSpec((1, 1, Wo, cin), _row_map(ky, H, 2)) for ky in range(3)])
        kernel = functools.partial(_conv3x3_s2_kernel, H=H, act=act)
        x_args = (xe, xe, xe, xo, xo, xo)

    in_specs += [pl.BlockSpec((3, 3, cin, N), lambda b, h: (0, 0, 0, 0)),
                 pl.BlockSpec((1, N), lambda b, h: (0, 0)),
                 pl.BlockSpec((1, cin), lambda b, h: (0, 0)),
                 pl.BlockSpec((1, cin), lambda b, h: (0, 0))]

    y, st = pl.pallas_call(
        kernel,
        grid=(B, Ho),
        in_specs=in_specs,
        out_specs=(pl.BlockSpec((1, 1, Wo, N), lambda b, h: (b, h, 0, 0)),
                   pl.BlockSpec((1, 1, 2, N), lambda b, h: (b, h, 0, 0))),
        out_shape=(jax.ShapeDtypeStruct((B, Ho, Wo, N), ACT_DTYPE),
                   jax.ShapeDtypeStruct((B, Ho, 2, N), jnp.float32)),
        compiler_params=pltpu.CompilerParams(
            dimension_semantics=("parallel", "parallel")),
    )(*x_args, wb, b2, s2, t2)
    # TODO(synk): for very long utterances also tile W (time) instead of one full row per step.
    return y, jnp.sum(st, axis=(0, 1))


# ----------------------- BN statistics -> per-channel affine -----------------------

def bn_affine(stats, count, gamma, beta, eps=1e-5):
    """Training-mode BatchNorm folded into a per-channel affine y*scale + shift."""
    mean = stats[0] / count
    var = jnp.maximum(stats[1] / count - mean * mean, 0.0)   # clamp (cancellation safety)
    scale = gamma * jax.lax.rsqrt(var + eps)
    shift = beta - mean * scale
    return scale, shift


# ---------------- fused  bn2 + bn(downsample) + residual add + ReLU ----------------

def _bn_add_relu_kernel(y_ref, s_ref, t_ref, r_ref, rs_ref, rt_ref, o_ref):
    y = y_ref[0, 0].astype(jnp.float32)
    r = r_ref[0, 0].astype(jnp.float32)
    out = y * s_ref[...] + t_ref[...] + r * rs_ref[...] + rt_ref[...]
    o_ref[0, 0] = jnp.maximum(out, 0.0).astype(o_ref.dtype)


def bn_add_relu(y, scale, shift, res, res_scale, res_shift):
    B, H, W, N = y.shape
    vec = lambda v: v.reshape(1, N).astype(jnp.float32)
    return pl.pallas_call(
        _bn_add_relu_kernel,
        grid=(B, H),
        in_specs=[pl.BlockSpec((1, 1, W, N), lambda b, h: (b, h, 0, 0)),
                  pl.BlockSpec((1, N), lambda b, h: (0, 0)),
                  pl.BlockSpec((1, N), lambda b, h: (0, 0)),
                  pl.BlockSpec((1, 1, W, N), lambda b, h: (b, h, 0, 0)),
                  pl.BlockSpec((1, N), lambda b, h: (0, 0)),
                  pl.BlockSpec((1, N), lambda b, h: (0, 0))],
        out_specs=pl.BlockSpec((1, 1, W, N), lambda b, h: (b, h, 0, 0)),
        out_shape=jax.ShapeDtypeStruct((B, H, W, N), ACT_DTYPE),
        compiler_params=pltpu.CompilerParams(
            dimension_semantics=("parallel", "parallel")),
    )(y, vec(scale), vec(shift), res, vec(res_scale), vec(res_shift))


# --------------- generic row matmul (+input affine, bias, act, BN stats) -----------
# Used for the 1x1 downsample conv and the first attention conv1d(k=1).

def _rows_mm_kernel(x_ref, w_ref, b_ref, s_ref, t_ref, y_ref, st_ref, *, M, act):
    i = pl.program_id(0)
    tm = x_ref.shape[0]
    x = x_ref[...].astype(jnp.float32) * s_ref[...] + t_ref[...]
    y = jnp.dot(x.astype(ACT_DTYPE), w_ref[...], preferred_element_type=jnp.float32)
    y = y + b_ref[...]
    if act == "relu":
        y = jnp.maximum(y, 0.0)
    y_ref[...] = y.astype(y_ref.dtype)
    rid = i * tm + jax.lax.broadcasted_iota(jnp.int32, (tm, 1), 0)
    mask = (rid < M).astype(jnp.float32)           # exclude padded rows from BN stats
    ym = y * mask
    st_ref[0] = jnp.concatenate([jnp.sum(ym, axis=0, keepdims=True),
                                 jnp.sum(ym * ym, axis=0, keepdims=True)], axis=0)


def rows_matmul(x2d, w, bias, in_scale, in_shift, *, act):
    M, K = x2d.shape
    N = w.shape[1]
    tm = min(1024, _round_up(M, 8))
    Mp = _round_up(M, tm)
    if Mp != M:
        x2d = jnp.pad(x2d, ((0, Mp - M), (0, 0)))
    nt = Mp // tm
    y, st = pl.pallas_call(
        functools.partial(_rows_mm_kernel, M=M, act=act),
        grid=(nt,),
        in_specs=[pl.BlockSpec((tm, K), lambda i: (i, 0)),
                  pl.BlockSpec((K, N), lambda i: (0, 0)),
                  pl.BlockSpec((1, N), lambda i: (0, 0)),
                  pl.BlockSpec((1, K), lambda i: (0, 0)),
                  pl.BlockSpec((1, K), lambda i: (0, 0))],
        out_specs=(pl.BlockSpec((tm, N), lambda i: (i, 0)),
                   pl.BlockSpec((1, 2, N), lambda i: (i, 0, 0))),
        out_shape=(jax.ShapeDtypeStruct((Mp, N), ACT_DTYPE),
                   jax.ShapeDtypeStruct((nt, 2, N), jnp.float32)),
        compiler_params=pltpu.CompilerParams(dimension_semantics=("parallel",)),
    )(x2d.astype(ACT_DTYPE), w.astype(ACT_DTYPE),
      bias.reshape(1, N).astype(jnp.float32),
      in_scale.reshape(1, K).astype(jnp.float32),
      in_shift.reshape(1, K).astype(jnp.float32))
    return (y[:M] if Mp != M else y), jnp.sum(st, axis=0)


# ----- fused attention tail: BN1d-apply -> conv1d(k=1) -> softmax(T) -> ASP -> fc ---

def _att_pool_kernel(xt_ref, h1_ref, s_ref, t_ref, w2_ref, b2_ref, wfc_ref, bfc_ref,
                     o_ref):
    h1 = h1_ref[0].astype(jnp.float32) * s_ref[...] + t_ref[...]          # (T, A)
    lg = jnp.dot(h1.astype(ACT_DTYPE), w2_ref[...],
                 preferred_element_type=jnp.float32) + b2_ref[...]         # (T, F)
    m = jnp.max(lg, axis=0, keepdims=True)
    e = jnp.exp(lg - m)
    w = e * pl.reciprocal(jnp.sum(e, axis=0, keepdims=True), approx=True)  # softmax(T)
    x = xt_ref[0].astype(jnp.float32)                                      # (T, F)
    mu = jnp.sum(x * w, axis=0, keepdims=True)                             # (1, F)
    ex2 = jnp.sum(x * x * w, axis=0, keepdims=True)
    sg = jnp.sqrt(jnp.maximum(ex2 - mu * mu, 1e-5))
    pooled = jnp.concatenate([mu, sg], axis=1)                             # (1, 2F)
    emb = jnp.dot(pooled, wfc_ref[...], preferred_element_type=jnp.float32) + bfc_ref[...]
    o_ref[0] = emb


def att_pool(xt, h1, s, t, w2, b2, wfc, bfc):
    B, T, F = xt.shape
    A = h1.shape[-1]
    E = wfc.shape[1]
    return pl.pallas_call(
        _att_pool_kernel,
        grid=(B,),
        in_specs=[pl.BlockSpec((1, T, F), lambda b: (b, 0, 0)),
                  pl.BlockSpec((1, T, A), lambda b: (b, 0, 0)),
                  pl.BlockSpec((1, A), lambda b: (0, 0)),
                  pl.BlockSpec((1, A), lambda b: (0, 0)),
                  pl.BlockSpec((A, F), lambda b: (0, 0)),
                  pl.BlockSpec((1, F), lambda b: (0, 0)),
                  pl.BlockSpec((2 * F, E), lambda b: (0, 0)),
                  pl.BlockSpec((1, E), lambda b: (0, 0))],
        out_specs=pl.BlockSpec((1, 1, E), lambda b: (b, 0, 0)),
        out_shape=jax.ShapeDtypeStruct((B, 1, E), jnp.float32),
        compiler_params=pltpu.CompilerParams(dimension_semantics=("parallel",)),
    )(xt.astype(ACT_DTYPE), h1.astype(ACT_DTYPE),
      s.reshape(1, A).astype(jnp.float32), t.reshape(1, A).astype(jnp.float32),
      w2.astype(ACT_DTYPE), b2.reshape(1, F).astype(jnp.float32),
      wfc.astype(jnp.float32), bfc.reshape(1, E).astype(jnp.float32))


# ------------------------------------ blocks ---------------------------------------

def se_basic_block(x, pend_s, pend_t, p):
    """conv1 -> ReLU -> bn1 -> conv2 -> bn2 -> (+residual/downsample) -> ReLU.
    (pend_s, pend_t) is the BatchNorm affine still pending on the block input."""
    stride = p["stride"]
    N = x.shape[-1]
    zero_b = jnp.zeros((N,), jnp.float32)

    y1, st1 = conv3x3(x, p["conv1_w"], zero_b, pend_s, pend_t, stride=stride, act="relu")
    B, Ho, Wo, _ = y1.shape
    cnt = B * Ho * Wo
    s1, t1 = bn_affine(st1, cnt, p["bn1_g"], p["bn1_b"])

    y2, st2 = conv3x3(y1, p["conv2_w"], zero_b, s1, t1, stride=1, act="none")
    s2, t2 = bn_affine(st2, cnt, p["bn2_g"], p["bn2_b"])

    if "ds_w" in p:
        xs = x[:, ::stride, ::stride, :].reshape(B * Ho * Wo, N)
        r2d, st_r = rows_matmul(xs, p["ds_w"], zero_b, pend_s, pend_t, act="none")
        rs, rt = bn_affine(st_r, cnt, p["ds_bn_g"], p["ds_bn_b"])
        res = r2d.reshape(B, Ho, Wo, N)
    else:
        res, rs, rt = x, pend_s, pend_t

    return bn_add_relu(y2, s2, t2, res, rs, rt)


# --------------------------------- full forward ------------------------------------

def resnetse_forward(x, params):
    """x: (B, time, n_mels) float32, as fed to the PyTorch module."""
    B, T, n_mels = x.shape
    cin0 = params["cin_pad"]

    # x.transpose(-1,-2).unsqueeze(1): NCHW (B,1,n_mels,T) -> our NHWC (B,n_mels,T,1)
    h = jnp.transpose(x, (0, 2, 1))[..., None]
    h = _pad_last(h, cin0).astype(ACT_DTYPE)

    # stem: conv (bias) -> ReLU -> bn1 (bn1 affine is kept pending and folded downstream)
    y, st = conv3x3(h, params["conv1_w"], params["conv1_b"],
                    jnp.ones((cin0,), jnp.float32), jnp.zeros((cin0,), jnp.float32),
                    stride=1, act="relu")
    cnt = B * y.shape[1] * y.shape[2]
    pend_s, pend_t = bn_affine(st, cnt, params["bn1_g"], params["bn1_b"])
    h = y

    ident = (jnp.ones((LANE,), jnp.float32), jnp.zeros((LANE,), jnp.float32))
    for layer in params["layers"]:
        for blk in layer:
            h = se_basic_block(h, pend_s, pend_t, blk)
            pend_s, pend_t = ident   # block outputs are fully materialised

    # PyTorch: (B,C,H,W).reshape(B, C*H, W).  Time-major equivalent: (B, T, C*H).
    C4 = params["c_final"]
    Bn, Hf, Wt, _ = h.shape
    F = C4 * Hf
    xt = jnp.transpose(h[..., :C4], (0, 2, 3, 1)).reshape(Bn, Wt, F)

    # attention conv1d(k=1) + ReLU + BN1d stats (one row-tiled kernel)
    A = params["att_w1"].shape[1]
    h1, st_a = rows_matmul(xt.reshape(Bn * Wt, F), params["att_w1"], params["att_b1"],
                           jnp.ones((F,), jnp.float32), jnp.zeros((F,), jnp.float32),
                           act="relu")
    sa, ta = bn_affine(st_a, Bn * Wt, params["att_bn_g"], params["att_bn_b"])
    h1 = h1.reshape(Bn, Wt, A)

    # fused BN-apply -> conv1d(k=1) -> softmax(time) -> attentive mean/std -> Linear
    emb = att_pool(xt, h1, sa, ta, params["att_w2"], params["att_b2"],
                   params["fc_w"], params["fc_b"])
    return emb                                                  # (B, 1, lin_neurons)


# -------------------------------- parameter init -----------------------------------

def init_params(key, layers=(1, 1, 1, 1), num_filters=(8, 8, 16, 16),
                n_mels=80, attention_channels=32, lin_neurons=64, cin_pad=8):
    keys = iter(jax.random.split(key, 256))
    nxt = lambda: next(keys)

    def conv_w(kh, kw, cin, cout, cin_p, cout_p):
        std = (2.0 / (kh * kw * cout)) ** 0.5       # kaiming_normal_, fan_out, relu
        w = std * jax.random.normal(nxt(), (kh, kw, cin, cout), jnp.float32)
        return jnp.pad(w, ((0, 0), (0, 0), (0, cin_p - cin), (0, cout_p - cout)))

    def lin_w(cin, cout):
        std = (1.0 / cin) ** 0.5
        return std * jax.random.normal(nxt(), (cin, cout), jnp.float32)

    p = {"cin_pad": cin_pad, "c_final": num_filters[3]}
    nf0 = num_filters[0]
    p["conv1_w"] = conv_w(3, 3, 1, nf0, cin_pad, LANE)
    p["conv1_b"] = jnp.pad(0.1 * jax.random.normal(nxt(), (nf0,), jnp.float32),
                           (0, LANE - nf0))
    p["bn1_g"] = jnp.ones((LANE,), jnp.float32)
    p["bn1_b"] = jnp.zeros((LANE,), jnp.float32)

    inplanes = nf0
    all_layers = []
    for li, (planes, nblocks) in enumerate(zip(num_filters, layers)):
        layer_stride = 1 if li == 0 else 2
        blocks = []
        for bi in range(nblocks):
            s = layer_stride if bi == 0 else 1
            blk = {"stride": s}
            blk["conv1_w"] = conv_w(3, 3, inplanes, planes, LANE, LANE)
            blk["bn1_g"] = jnp.ones((LANE,), jnp.float32)
            blk["bn1_b"] = jnp.zeros((LANE,), jnp.float32)
            blk["conv2_w"] = conv_w(3, 3, planes, planes, LANE, LANE)
            blk["bn2_g"] = jnp.ones((LANE,), jnp.float32)
            blk["bn2_b"] = jnp.zeros((LANE,), jnp.float32)
            if s != 1 or inplanes != planes:
                blk["ds_w"] = conv_w(1, 1, inplanes, planes, LANE, LANE).reshape(LANE, LANE)
                blk["ds_bn_g"] = jnp.ones((LANE,), jnp.float32)
                blk["ds_bn_b"] = jnp.zeros((LANE,), jnp.float32)
            blocks.append(blk)
            inplanes = planes
        all_layers.append(blocks)
    p["layers"] = all_layers

    outmap = n_mels // 8           # == 10, matching the hardcoded value in the module
    F = num_filters[3] * outmap
    p["att_w1"] = lin_w(F, attention_channels)
    p["att_b1"] = 0.1 * jax.random.normal(nxt(), (attention_channels,), jnp.float32)
    p["att_bn_g"] = jnp.ones((attention_channels,), jnp.float32)
    p["att_bn_b"] = jnp.zeros((attention_channels,), jnp.float32)
    p["att_w2"] = lin_w(attention_channels, F)
    p["att_b2"] = 0.1 * jax.random.normal(nxt(), (F,), jnp.float32)
    p["fc_w"] = lin_w(2 * F, lin_neurons)          # encoder_type='ASP' -> out_dim = 2F
    p["fc_b"] = 0.1 * jax.random.normal(nxt(), (lin_neurons,), jnp.float32)
    return p


# --------------------------------------- main --------------------------------------

if __name__ == "__main__":
    key = jax.random.PRNGKey(0)
    pkey, xkey = jax.random.split(key)

    # Small config: layers=[1,1,1,1], num_filters=[8,8,16,16], n_mels=80 (required by the
    # hardcoded outmap_size=10), attention_channels=32, lin_neurons=64, encoder 'ASP'.
    params = init_params(pkey)

    B, T, n_mels = 2, 16, 80
    x = jax.random.normal(xkey, (B, T, n_mels), jnp.float32)

    out = resnetse_forward(x, params)
    out = jax.block_until_ready(out)

    assert out.shape == (B, 1, 64), out.shape
    assert bool(jnp.all(jnp.isfinite(out)))
    print("KERNEL_OK")
</pallas_src>

<mosaic_0001>
module attributes {stable_mosaic.version = 11 : i64} {
  func.func @_conv3x3_s1_kernel(%arg0: i32, %arg1: i32, %arg2: memref<1x1x16x8xbf16, #tpu.memory_space<vmem>>, %arg3: memref<1x1x16x8xbf16, #tpu.memory_space<vmem>>, %arg4: memref<1x1x16x8xbf16, #tpu.memory_space<vmem>>, %arg5: memref<3x3x8x128xbf16, #tpu.memory_space<vmem>>, %arg6: memref<1x128xf32, #tpu.memory_space<vmem>>, %arg7: memref<1x8xf32, #tpu.memory_space<vmem>>, %arg8: memref<1x8xf32, #tpu.memory_space<vmem>>, %arg9: memref<1x1x16x128xbf16, #tpu.memory_space<vmem>>, %arg10: memref<1x1x2x128xf32, #tpu.memory_space<vmem>>) attributes {dimension_semantics = [#tpu.dimension_semantics<parallel>, #tpu.dimension_semantics<parallel>], iteration_bounds = array<i64: 2, 80>, scalar_prefetch = 0 : i64, scratch_operands = 0 : i64, tpu.core_type = #tpu.core_type<tc>, window_params = [{transform_indices = @transform_0, window_bounds = array<i64: 1, 1, 16, 8>}, {transform_indices = @transform_1, window_bounds = array<i64: 1, 1, 16, 8>}, {transform_indices = @transform_2, window_bounds = array<i64: 1, 1, 16, 8>}, {pipeline_mode = #tpu.pipeline_mode<synchronous>, transform_indices = @transform_3, window_bounds = array<i64: 3, 3, 8, 128>}, {pipeline_mode = #tpu.pipeline_mode<synchronous>, transform_indices = @transform_4, window_bounds = array<i64: 1, 128>}, {pipeline_mode = #tpu.pipeline_mode<synchronous>, transform_indices = @transform_5, window_bounds = array<i64: 1, 8>}, {pipeline_mode = #tpu.pipeline_mode<synchronous>, transform_indices = @transform_6, window_bounds = array<i64: 1, 8>}, {transform_indices = @transform_7, window_bounds = array<i64: 1, 1, 16, 128>}, {transform_indices = @transform_8, window_bounds = array<i64: 1, 1, 2, 128>}]} {
    %c0 = arith.constant 0 : index
    %c0_0 = arith.constant 0 : index
    %0 = vector.load %arg7[%c0, %c0_0] : memref<1x8xf32, #tpu.memory_space<vmem>>, vector<1x8xf32>
    %c0_1 = arith.constant 0 : index
    %c0_2 = arith.constant 0 : index
    %1 = vector.load %arg8[%c0_1, %c0_2] : memref<1x8xf32, #tpu.memory_space<vmem>>, vector<1x8xf32>
    %c0_3 = arith.constant 0 : index
    %c0_4 = arith.constant 0 : index
    %c0_5 = arith.constant 0 : index
    %c0_6 = arith.constant 0 : index
    %2 = vector.load %arg2[%c0_3, %c0_4, %c0_5, %c0_6] : memref<1x1x16x8xbf16, #tpu.memory_space<vmem>>, vector<1x1x16x8xbf16>
    %3 = vector.shape_cast %2 : vector<1x1x16x8xbf16> to vector<16x8xbf16>
    %c0_7 = arith.constant 0 : index
    %c0_8 = arith.constant 0 : index
    %c0_9 = arith.constant 0 : index
    %c0_10 = arith.constant 0 : index
    %4 = vector.load %arg3[%c0_7, %c0_8, %c0_9, %c0_10] : memref<1x1x16x8xbf16, #tpu.memory_space<vmem>>, vector<1x1x16x8xbf16>
    %5 = vector.shape_cast %4 : vector<1x1x16x8xbf16> to vector<16x8xbf16>
    %c0_11 = arith.constant 0 : index
    %c0_12 = arith.constant 0 : index
    %c0_13 = arith.constant 0 : index
    %c0_14 = arith.constant 0 : index
    %6 = vector.load %arg4[%c0_11, %c0_12, %c0_13, %c0_14] : memref<1x1x16x8xbf16, #tpu.memory_space<vmem>>, vector<1x1x16x8xbf16>
    %7 = vector.shape_cast %6 : vector<1x1x16x8xbf16> to vector<16x8xbf16>
    %cst = arith.constant 0.000000e+00 : f32
    %8 = vector.broadcast %cst : f32 to vector<16x128xf32>
    %cst_15 = arith.constant 0.000000e+00 : f32
    %9 = vector.broadcast %cst_15 : f32 to vector<1x128xf32>
    %10 = arith.extf %3 : vector<16x8xbf16> to vector<16x8xf32>
    %11 = vector.broadcast %0 : vector<1x8xf32> to vector<16x8xf32>
    %12 = arith.mulf %10, %11 : vector<16x8xf32>
    %13 = vector.broadcast %1 : vector<1x8xf32> to vector<16x8xf32>
    %14 = arith.addf %12, %13 : vector<16x8xf32>
    %15 = arith.truncf %14 : vector<16x8xf32> to vector<16x8xbf16>
    %c0_i32 = arith.constant 0 : i32
    %16 = arith.addi %arg1, %c0_i32 : i32
    %c1_i32 = arith.constant 1 : i32
    %17 = arith.subi %16, %c1_i32 : i32
    %c0_i32_16 = arith.constant 0 : i32
    %18 = arith.cmpi sge, %17, %c0_i32_16 : i32
    %c79_i32 = arith.constant 79 : i32
    %19 = arith.cmpi sle, %17, %c79_i32 : i32
    %20 = arith.andi %18, %19 : i1
    %21 = arith.extui %20 : i1 to i32
    %22 = arith.sitofp %21 : i32 to f32
    %c0_17 = arith.constant 0 : index
    %c1 = arith.constant 1 : index
    %c0_18 = arith.constant 0 : index
    %c0_19 = arith.constant 0 : index
    %23 = vector.load %arg5[%c0_17, %c1, %c0_18, %c0_19] : memref<3x3x8x128xbf16, #tpu.memory_space<vmem>>, vector<1x1x8x128xbf16>
    %24 = vector.shape_cast %23 : vector<1x1x8x128xbf16> to vector<8x128xbf16>
    %cst_20 = arith.constant dense<0.000000e+00> : vector<16x128xf32>
    %25 = tpu.matmul %15, %24, %cst_20 {dimension_numbers = #tpu.dot_dimension_numbers<[1], [0], [0], [1], [0, 0, 1, 1], [], []>} : vector<16x8xbf16>, vector<8x128xbf16>, vector<16x128xf32> -> vector<16x128xf32>
    %c0_21 = arith.constant 0 : index
    %c0_22 = arith.constant 0 : index
    %c0_23 = arith.constant 0 : index
    %c0_24 = arith.constant 0 : index
    %26 = vector.load %arg5[%c0_21, %c0_22, %c0_23, %c0_24] : memref<3x3x8x128xbf16, #tpu.memory_space<vmem>>, vector<1x1x8x128xbf16>
    %27 = vector.shape_cast %26 : vector<1x1x8x128xbf16> to vector<8x128xbf16>
    %cst_25 = arith.constant dense<0.000000e+00> : vector<16x128xf32>
    %28 = tpu.matmul %15, %27, %cst_25 {dimension_numbers = #tpu.dot_dimension_numbers<[1], [0], [0], [1], [0, 0, 1, 1], [], []>} : vector<16x8xbf16>, vector<8x128xbf16>, vector<16x128xf32> -> vector<16x128xf32>
    %c0_26 = arith.constant 0 : index
    %c2 = arith.constant 2 : index
    %c0_27 = arith.constant 0 : index
    %c0_28 = arith.constant 0 : index
    %29 = vector.load %arg5[%c0_26, %c2, %c0_27, %c0_28] : memref<3x3x8x128xbf16, #tpu.memory_space<vmem>>, vector<1x1x8x128xbf16>
    %30 = vector.shape_cast %29 : vector<1x1x8x128xbf16> to vector<8x128xbf16>
    %cst_29 = arith.constant dense<0.000000e+00> : vector<16x128xf32>
    %31 = tpu.matmul %15, %30, %cst_29 {dimension_numbers = #tpu.dot_dimension_numbers<[1], [0], [0], [1], [0, 0, 1, 1], [], []>} : vector<16x8xbf16>, vector<8x128xbf16>, vector<16x128xf32> -> vector<16x128xf32>
    %32 = vector.extract_strided_slice %28 {offsets = [0, 0], sizes = [15, 128], strides = [1, 1]} : vector<16x128xf32> to vector<15x128xf32>
    %33 = tpu.concatenate %9, %32 in 0 : vector<1x128xf32>, vector<15x128xf32> -> vector<16x128xf32>
    %34 = vector.extract_strided_slice %31 {offsets = [1, 0], sizes = [15, 128], strides = [1, 1]} : vector<16x128xf32> to vector<15x128xf32>
    %35 = tpu.concatenate %34, %9 in 0 : vector<15x128xf32>, vector<1x128xf32> -> vector<16x128xf32>
    %36 = arith.addf %33, %25 : vector<16x128xf32>
    %37 = arith.addf %36, %35 : vector<16x128xf32>
    %38 = vector.broadcast %22 : f32 to vector<16x128xf32>
    %39 = arith.mulf %38, %37 : vector<16x128xf32>
    %40 = arith.addf %8, %39 : vector<16x128xf32>
    %41 = arith.extf %5 : vector<16x8xbf16> to vector<16x8xf32>
    %42 = vector.broadcast %0 : vector<1x8xf32> to vector<16x8xf32>
    %43 = arith.mulf %41, %42 : vector<16x8xf32>
    %44 = vector.broadcast %1 : vector<1x8xf32> to vector<16x8xf32>
    %45 = arith.addf %43, %44 : vector<16x8xf32>
    %46 = arith.truncf %45 : vector<16x8xf32> to vector<16x8xbf16>
    %c1_i32_30 = arith.constant 1 : i32
    %47 = arith.addi %arg1, %c1_i32_30 : i32
    %c1_i32_31 = arith.constant 1 : i32
    %48 = arith.subi %47, %c1_i32_31 : i32
    %c0_i32_32 = arith.constant 0 : i32
    %49 = arith.cmpi sge, %48, %c0_i32_32 : i32
    %c79_i32_33 = arith.constant 79 : i32
    %50 = arith.cmpi sle, %48, %c79_i32_33 : i32
    %51 = arith.andi %49, %50 : i1
    %52 = arith.extui %51 : i1 to i32
    %53 = arith.sitofp %52 : i32 to f32
    %c1_34 = arith.constant 1 : index
    %c1_35 = arith.constant 1 : index
    %c0_36 = arith.constant 0 : index
    %c0_37 = arith.constant 0 : index
    %54 = vector.load %arg5[%c1_34, %c1_35, %c0_36, %c0_37] : memref<3x3x8x128xbf16, #tpu.memory_space<vmem>>, vector<1x1x8x128xbf16>
    %55 = vector.shape_cast %54 : vector<1x1x8x128xbf16> to vector<8x128xbf16>
    %cst_38 = arith.constant dense<0.000000e+00> : vector<16x128xf32>
    %56 = tpu.matmul %46, %55, %cst_38 {dimension_numbers = #tpu.dot_dimension_numbers<[1], [0], [0], [1], [0, 0, 1, 1], [], []>} : vector<16x8xbf16>, vector<8x128xbf16>, vector<16x128xf32> -> vector<16x128xf32>
    %c1_39 = arith.constant 1 : index
    %c0_40 = arith.constant 0 : index
    %c0_41 = arith.constant 0 : index
    %c0_42 = arith.constant 0 : index
    %57 = vector.load %arg5[%c1_39, %c0_40, %c0_41, %c0_42] : memref<3x3x8x128xbf16, #tpu.memory_space<vmem>>, vector<1x1x8x128xbf16>
    %58 = vector.shape_cast %57 : vector<1x1x8x128xbf16> to vector<8x128xbf16>
    %cst_43 = arith.constant dense<0.000000e+00> : vector<16x128xf32>
    %59 = tpu.matmul %46, %58, %cst_43 {dimension_numbers = #tpu.dot_dimension_numbers<[1], [0], [0], [1], [0, 0, 1, 1], [], []>} : vector<16x8xbf16>, vector<8x128xbf16>, vector<16x128xf32> -> vector<16x128xf32>
    %c1_44 = arith.constant 1 : index
    %c2_45 = arith.constant 2 : index
    %c0_46 = arith.constant 0 : index
    %c0_47 = arith.constant 0 : index
    %60 = vector.load %arg5[%c1_44, %c2_45, %c0_46, %c0_47] : memref<3x3x8x128xbf16, #tpu.memory_space<vmem>>, vector<1x1x8x128xbf16>
    %61 = vector.shape_cast %60 : vector<1x1x8x128xbf16> to vector<8x128xbf16>
    %cst_48 = arith.constant dense<0.000000e+00> : vector<16x128xf32>
    %62 = tpu.matmul %46, %61, %cst_48 {dimension_numbers = #tpu.dot_dimension_numbers<[1], [0], [0], [1], [0, 0, 1, 1], [], []>} : vector<16x8xbf16>, vector<8x128xbf16>, vector<16x128xf32> -> vector<16x128xf32>
    %63 = vector.extract_strided_slice %59 {offsets = [0, 0], sizes = [15, 128], strides = [1, 1]} : vector<16x128xf32> to vector<15x128xf32>
    %64 = tpu.concatenate %9, %63 in 0 : vector<1x128xf32>, vector<15x128xf32> -> vector<16x128xf32>
    %65 = vector.extract_strided_slice %62 {offsets = [1, 0], sizes = [15, 128], strides = [1, 1]} : vector<16x128xf32> to vector<15x128xf32>
    %66 = tpu.concatenate %65, %9 in 0 : vector<15x128xf32>, vector<1x128xf32> -> vector<16x128xf32>
    %67 = arith.addf %64, %56 : vector<16x128xf32>
    %68 = arith.addf %67, %66 : vector<16x128xf32>
    %69 = vector.broadcast %53 : f32 to vector<16x128xf32>
    %70 = arith.mulf %69, %68 : vector<16x128xf32>
    %71 = arith.addf %40, %70 : vector<16x128xf32>
    %72 = arith.extf %7 : vector<16x8xbf16> to vector<16x8xf32>
    %73 = vector.broadcast %0 : vector<1x8xf32> to vector<16x8xf32>
    %74 = arith.mulf %72, %73 : vector<16x8xf32>
    %75 = vector.broadcast %1 : vector<1x8xf32> to vector<16x8xf32>
    %76 = arith.addf %74, %75 : vector<16x8xf32>
    %77 = arith.truncf %76 : vector<16x8xf32> to vector<16x8xbf16>
    %c2_i32 = arith.constant 2 : i32
    %78 = arith.addi %arg1, %c2_i32 : i32
    %c1_i32_49 = arith.constant 1 : i32
    %79 = arith.subi %78, %c1_i32_49 : i32
    %c0_i32_50 = arith.constant 0 : i32
    %80 = arith.cmpi sge, %79, %c0_i32_50 : i32
    %c79_i32_51 = arith.constant 79 : i32
    %81 = arith.cmpi sle, %79, %c79_i32_51 : i32
    %82 = arith.andi %80, %81 : i1
    %83 = arith.extui %82 : i1 to i32
    %84 = arith.sitofp %83 : i32 to f32
    %c2_52 = arith.constant 2 : index
    %c1_53 = arith.constant 1 : index
    %c0_54 = arith.constant 0 : index
    %c0_55 = arith.constant 0 : index
    %85 = vector.load %arg5[%c2_52, %c1_53, %c0_54, %c0_55] : memref<3x3x8x128xbf16, #tpu.memory_space<vmem>>, vector<1x1x8x128xbf16>
    %86 = vector.shape_cast %85 : vector<1x1x8x128xbf16> to vector<8x128xbf16>
    %cst_56 = arith.constant dense<0.000000e+00> : vector<16x128xf32>
    %87 = tpu.matmul %77, %86, %cst_56 {dimension_numbers = #tpu.dot_dimension_numbers<[1], [0], [0], [1], [0, 0, 1, 1], [], []>} : vector<16x8xbf16>, vector<8x128xbf16>, vector<16x128xf32> -> vector<16x128xf32>
    %c2_57 = arith.constant 2 : index
    %c0_58 = arith.constant 0 : index
    %c0_59 = arith.constant 0 : index
    %c0_60 = arith.constant 0 : index
    %88 = vector.load %arg5[%c2_57, %c0_58, %c0_59, %c0_60] : memref<3x3x8x128xbf16, #tpu.memory_space<vmem>>, vector<1x1x8x128xbf16>
    %89 = vector.shape_cast %88 : vector<1x1x8x128xbf16> to vector<8x128xbf16>
    %cst_61 = arith.constant dense<0.000000e+00> : vector<16x128xf32>
    %90 = tpu.matmul %77, %89, %cst_61 {dimension_numbers = #tpu.dot_dimension_numbers<[1], [0], [0], [1], [0, 0, 1, 1], [], []>} : vector<16x8xbf16>, vector<8x128xbf16>, vector<16x128xf32> -> vector<16x128xf32>
    %c2_62 = arith.constant 2 : index
    %c2_63 = arith.constant 2 : index
    %c0_64 = arith.constant 0 : index
    %c0_65 = arith.constant 0 : index
    %91 = vector.load %arg5[%c2_62, %c2_63, %c0_64, %c0_65] : memref<3x3x8x128xbf16, #tpu.memory_space<vmem>>, vector<1x1x8x128xbf16>
    %92 = vector.shape_cast %91 : vector<1x1x8x128xbf16> to vector<8x128xbf16>
    %cst_66 = arith.constant dense<0.000000e+00> : vector<16x128xf32>
    %93 = tpu.matmul %77, %92, %cst_66 {dimension_numbers = #tpu.dot_dimension_numbers<[1], [0], [0], [1], [0, 0, 1, 1], [], []>} : vector<16x8xbf16>, vector<8x128xbf16>, vector<16x128xf32> -> vector<16x128xf32>
    %94 = vector.extract_strided_slice %90 {offsets = [0, 0], sizes = [15, 128], strides = [1, 1]} : vector<16x128xf32> to vector<15x128xf32>
    %95 = tpu.concatenate %9, %94 in 0 : vector<1x128xf32>, vector<15x128xf32> -> vector<16x128xf32>
    %96 = vector.extract_strided_slice %93 {offsets = [1, 0], sizes = [15, 128], strides = [1, 1]} : vector<16x128xf32> to vector<15x128xf32>
    %97 = tpu.concatenate %96, %9 in 0 : vector<15x128xf32>, vector<1x128xf32> -> vector<16x128xf32>
    %98 = arith.addf %95, %87 : vector<16x128xf32>
    %99 = arith.addf %98, %97 : vector<16x128xf32>
    %100 = vector.broadcast %84 : f32 to vector<16x128xf32>
    %101 = arith.mulf %100, %99 : vector<16x128xf32>
    %102 = arith.addf %71, %101 : vector<16x128xf32>
    %c0_67 = arith.constant 0 : index
    %c0_68 = arith.constant 0 : index
    %103 = vector.load %arg6[%c0_67, %c0_68] : memref<1x128xf32, #tpu.memory_space<vmem>>, vector<1x128xf32>
    %104 = vector.broadcast %103 : vector<1x128xf32> to vector<16x128xf32>
    %105 = arith.addf %102, %104 : vector<16x128xf32>
    %cst_69 = arith.constant 0.000000e+00 : f32
    %106 = vector.broadcast %cst_69 : f32 to vector<16x128xf32>
    %107 = arith.maximumf %105, %106 : vector<16x128xf32>
    %108 = arith.truncf %107 : vector<16x128xf32> to vector<16x128xbf16>
    %c0_70 = arith.constant 0 : index
    %c0_71 = arith.constant 0 : index
    %c0_72 = arith.constant 0 : index
    %c0_73 = arith.constant 0 : index
    %109 = vector.load %arg9[%c0_70, %c0_71, %c0_72, %c0_73] : memref<1x1x16x128xbf16, #tpu.memory_space<vmem>>, vector<1x1x16x128xbf16>
    %110 = vector.shape_cast %109 : vector<1x1x16x128xbf16> to vector<16x128xbf16>
    %111 = vector.shape_cast %108 : vector<16x128xbf16> to vector<1x1x16x128xbf16>
    tpu.vector_store %arg9[%c0_70, %c0_71, %c0_72, %c0_73], %111 {strides = array<i32>} : memref<1x1x16x128xbf16, #tpu.memory_space<vmem>>, vector<1x1x16x128xbf16>,
    %cst_74 = arith.constant dense<0.000000e+00> : vector<128xf32>
    %112 = vector.multi_reduction <add>, %107, %cst_74 [0] : vector<16x128xf32> to vector<128xf32>
    %113 = vector.shape_cast %112 : vector<128xf32> to vector<1x128xf32>
    %114 = arith.mulf %107, %107 : vector<16x128xf32>
    %cst_75 = arith.constant dense<0.000000e+00> : vector<128xf32>
    %115 = vector.multi_reduction <add>, %114, %cst_75 [0] : vector<16x128xf32> to vector<128xf32>
    %116 = vector.shape_cast %115 : vector<128xf32> to vector<1x128xf32>
    %117 = tpu.concatenate %113, %116 in 0 : vector<1x128xf32>, vector<1x128xf32> -> vector<2x128xf32>
    %c0_76 = arith.constant 0 : index
    %c0_77 = arith.constant 0 : index
    %c0_78 = arith.constant 0 : index
    %c0_79 = arith.constant 0 : index
    %118 = vector.load %arg10[%c0_76, %c0_77, %c0_78, %c0_79] : memref<1x1x2x128xf32, #tpu.memory_space<vmem>>, vector<1x1x2x128xf32>
    %119 = vector.shape_cast %118 : vector<1x1x2x128xf32> to vector<2x128xf32>
    %120 = vector.shape_cast %117 : vector<2x128xf32> to vector<1x1x2x128xf32>
    tpu.vector_store %arg10[%c0_76, %c0_77, %c0_78, %c0_79], %120 {strides = array<i32>} : memref<1x1x2x128xf32, #tpu.memory_space<vmem>>, vector<1x1x2x128xf32>,
    return
  }
  func.func @transform_0(%arg0: i32, %arg1: i32) -> (i32, i32, i32, i32) {
    %c1_i32 = arith.constant 1 : i32
    %0 = arith.muli %c1_i32, %arg1 : i32
    %c0_i32 = arith.constant 0 : i32
    %1 = arith.addi %0, %c0_i32 : i32
    %c1_i32_0 = arith.constant 1 : i32
    %2 = arith.subi %1, %c1_i32_0 : i32
    %c0_i32_1 = arith.constant 0 : i32
    %c79_i32 = arith.constant 79 : i32
    %3 = arith.maxsi %c0_i32_1, %2 : i32
    %4 = arith.minsi %c79_i32, %3 : i32
    %c0_i32_2 = arith.constant 0 : i32
    %c0_i32_3 = arith.constant 0 : i32
    %c0_i32_4 = arith.constant 0 : i32
    return %arg0, %4, %c0_i32_2, %c0_i32_3 : i32, i32, i32, i32
  }
  func.func @transform_1(%arg0: i32, %arg1: i32) -> (i32, i32, i32, i32) {
    %c1_i32 = arith.constant 1 : i32
    %0 = arith.muli %c1_i32, %arg1 : i32
    %c1_i32_0 = arith.constant 1 : i32
    %1 = arith.addi %0, %c1_i32_0 : i32
    %c1_i32_1 = arith.constant 1 : i32
    %2 = arith.subi %1, %c1_i32_1 : i32
    %c0_i32 = arith.constant 0 : i32
    %c79_i32 = arith.constant 79 : i32
    %3 = arith.maxsi %c0_i32, %2 : i32
    %4 = arith.minsi %c79_i32, %3 : i32
    %c0_i32_2 = arith.constant 0 : i32
    %c0_i32_3 = arith.constant 0 : i32
    %c0_i32_4 = arith.constant 0 : i32
    return %arg0, %4, %c0_i32_2, %c0_i32_3 : i32, i32, i32, i32
  }
  func.func @transform_2(%arg0: i32, %arg1: i32) -> (i32, i32, i32, i32) {
    %c1_i32 = arith.constant 1 : i32
    %0 = arith.muli %c1_i32, %arg1 : i32
    %c2_i32 = arith.constant 2 : i32
    %1 = arith.addi %0, %c2_i32 : i32
    %c1_i32_0 = arith.constant 1 : i32
    %2 = arith.subi %1, %c1_i32_0 : i32
    %c0_i32 = arith.constant 0 : i32
    %c79_i32 = arith.constant 79 : i32
    %3 = arith.maxsi %c0_i32, %2 : i32
    %4 = arith.minsi %c79_i32, %3 : i32
    %c0_i32_1 = arith.constant 0 : i32
    %c0_i32_2 = arith.constant 0 : i32
    %c0_i32_3 = arith.constant 0 : i32
    return %arg0, %4, %c0_i32_1, %c0_i32_2 : i32, i32, i32, i32
  }
  func.func @transform_3(%arg0: i32, %arg1: i32) -> (i32, i32, i32, i32) {
    %c0_i32 = arith.constant 0 : i32
    %c0_i32_0 = arith.constant 0 : i32
    %c0_i32_1 = arith.constant 0 : i32
    %c0_i32_2 = arith.constant 0 : i32
    %c0_i32_3 = arith.constant 0 : i32
    return %c0_i32, %c0_i32_0, %c0_i32_1, %c0_i32_2 : i32, i32, i32, i32
  }
  func.func @transform_4(%arg0: i32, %arg1: i32) -> (i32, i32) {
    %c0_i32 = arith.constant 0 : i32
    %c0_i32_0 = arith.constant 0 : i32
    %c0_i32_1 = arith.constant 0 : i32
    return %c0_i32, %c0_i32_0 : i32, i32
  }
  func.func @transform_5(%arg0: i32, %arg1: i32) -> (i32, i32) {
    %c0_i32 = arith.constant 0 : i32
    %c0_i32_0 = arith.constant 0 : i32
    %c0_i32_1 = arith.constant 0 : i32
    return %c0_i32, %c0_i32_0 : i32, i32
  }
  func.func @transform_6(%arg0: i32, %arg1: i32) -> (i32, i32) {
    %c0_i32 = arith.constant 0 : i32
    %c0_i32_0 = arith.constant 0 : i32
    %c0_i32_1 = arith.constant 0 : i32
    return %c0_i32, %c0_i32_0 : i32, i32
  }
  func.func @transform_7(%arg0: i32, %arg1: i32) -> (i32, i32, i32, i32) {
    %c0_i32 = arith.constant 0 : i32
    %c0_i32_0 = arith.constant 0 : i32
    %c0_i32_1 = arith.constant 0 : i32
    return %arg0, %arg1, %c0_i32, %c0_i32_0 : i32, i32, i32, i32
  }
  func.func @transform_8(%arg0: i32, %arg1: i32) -> (i32, i32, i32, i32) {
    %c0_i32 = arith.constant 0 : i32
    %c0_i32_0 = arith.constant 0 : i32
    %c0_i32_1 = arith.constant 0 : i32
    return %arg0, %arg1, %c0_i32, %c0_i32_0 : i32, i32, i32, i32
  }
}

</mosaic_0001>

<bundles_post_ra>
// kernel: tpu_custom_call.1
= control target key start
LH: loop header
LB: loop body
LE: loop exit
PB: predicated region body
PF: predicated region fallthrough
CT: control target
= control target key end

     0   :  { %14 = vsyncpa [#allocation3], 0  ;;  %s2102_s0 = inlined_call_operand.vmem [shape: bf16[2,80,16,8], index: 0, kind: input, shape index: {}]   ;;  %s2103_s1 = inlined_call_operand.vmem [shape: bf16[2,80,16,8], index: 1, kind: input, shape index: {}]   ;;  %s2104_s2 = inlined_call_operand.vmem [shape: bf16[2,80,16,8], index: 2, kind: input, shape index: {}]   ;;  %s2105_s3 = inlined_call_operand.vmem [shape: bf16[3,3,8,128], index: 3, kind: input, shape index: {}]   ;;  %s2106_s4 = inlined_call_operand.vmem [shape: f32[1,128], index: 4, kind: input, shape index: {}]   ;;  %s2107_s5 = inlined_call_operand.vmem [shape: f32[1,8], index: 5, kind: input, shape index: {}]   ;;  %s2108_s6 = inlined_call_operand.vmem [shape: f32[1,8], index: 6, kind: input, shape index: {}]   ;;  %s2109_s7 = inlined_call_operand.hbm [shape: bf16[2,80,16,128], index: 7, kind: output, shape index: {0}]   ;;  %s2110_s8 = inlined_call_operand.hbm [shape: f32[2,80,2,128], index: 8, kind: output, shape index: {1}]  }
   0x1   :  { %16 = vsyncpa [#allocation3 + $0x1], 0 }
   0x2   :  { %17 = vsyncpa [#allocation5], 0 }
   0x3   :  { %19 = vsyncpa [#allocation5 + $0x1], 0  ;;  %s1767_s27 = smov 0   ;;  %s1769_s28 = smov 0  }
   0x4   :  { %s1771_s29 = smov 0   ;;  %s1773_s30 = smov 0  }
   0x5   :  { %s1775_s9 = smov 0   ;;  %s1777_s10 = smov 0  }
   0x6   :  { %s1779_s11 = smov 0   ;;  %s1781_s12 = smov 0  }
   0x7 LB: > { %2116 = sst [smem:[#allocation8_spill]] %s1694_s29  ;;  %s1310_s13 = sadd.s32 4294967295, %s1714_s12   ;;  %s1714_s12 = sphi %s1781_s12, %s25_s12   ;;  %s1710_s11 = sphi %s1779_s11, %s2132_s11   ;;  %s1706_s10 = sphi %s1777_s10, %s2131_s10   ;;  %s1702_s9 = sphi %s1775_s9, %s2130_s9   ;;  %s1698_s30 = sphi %s1773_s30, %s2129_s30   ;;  %s1694_s29 = sphi %s1771_s29, %s2128_s29   ;;  %s1690_s28 = sphi %s1769_s28, %s2134_s28   ;;  %s1686_s27 = sphi %s1767_s27, %s2133_s27  }
   0x8   : > { %2117 = sst [smem:[#allocation9_spill]] %s1706_s10  ;;  %s1311_s14 = sadd.s32 4294967294, %s1714_s12  }
   0x9   : > { %2118 = sst [smem:[#allocation10_spill]] %s1710_s11  ;;  %s34_s15 = sadd.s32 1, %s1706_s10 }
   0xa   : > { %p35_p0 = scmp.ge.s32.totalorder %s34_s15, 80  ;;  %s37_s16 = sadd.s32 1, %s1710_s11 }
   0xb   : > { %p252_p1 = scmp.ne.s32.totalorder %s1694_s29, %s1690_s28  ;;  %p253_p2 = scmp.eq.s32.totalorder %s1310_s13, 159 }
   0xc   : > { %s2136_s15 = smov (%p35_p0, %s34_s15), 0  ;;  %s2138_s16 = smov (!%p35_p0, %s37_s16), %s1710_s11 }
   0xd   : > { %2119 = sst [smem:[#allocation11_spill]] %s2136_s15  ;;  %s238_s17 = ssub.s32 %s1706_s10, %s2136_s15 }
   0xe   : > { %p1818_p3 = por %p253_p2, %p252_p1  ;;  %p39_p4 = scmp.ge.s32.totalorder %s2138_s16, 2 }
   0xf   : > { %p258_p5 = scmp.ne.s32.totalorder %s1690_s28, %s1686_s27  ;;  %p259_p6 = scmp.eq.s32.totalorder %s1311_s14, 159 }
  0x10   : > { %p1344_p7 = scmp.ge.s32.totalorder %s1714_s12, 1  ;;  %s2140_s16 = smov (%p39_p4, %s2138_s16), 0 }
  0x11   : > { %2121 = sst [smem:[#allocation12_spill]] %s2140_s16  ;;  %p1827_p8 = por %p259_p6, %p258_p5 }
  0x12   : > { %p381_p9 = scmp.lt.s32.totalorder %s1714_s12, 161  ;;  %s237_s20 = ssub.s32 %s1710_s11, %s2140_s16 }
  0x13   : > { %s242_s21 = sadd.s32 1, %s1694_s29  ;;  %s239_s22 = sor.u32 %s238_s17, %s237_s20 }
  0x14   : > { %p382_p10 = pnand %p1344_p7, %p381_p9  ;;  %p240_p11 = scmp.eq.s32.totalorder %s239_s22, 0 }
  0x15   : > { %s1849_s14 = sadd.s32 (!%p382_p10), 4294967295, %s1698_s30  ;;  %p461_p12 = scmp.lt.s32.totalorder (!%p382_p10), %s1702_s9, 1 }
  0x16   : > { %s1836_s23 = scalar_select %p240_p11, %s1694_s29, %s242_s21  }
  0x17   : > { %385 = sbr.rel (%p382_p10) target bundleno = 333 (0x14d), region = 48  ;;  %p457_p13 = scmp.gt.s32.totalorder (!%p382_p10), %s1849_s14, 0 }
  0x18   : > { %2123 = sst [smem:[#allocation13_spill]] %s1836_s23  ;;  %p1347_p0 = scmp.lt.s32.totalorder (!%p382_p10), %s1849_s14, 79 }
  0x19   : > { %p475_p1 = scmp.gt.s32.totalorder (!%p382_p10), %s1698_s30, 0  ;;  %p1354_p4 = scmp.lt.s32.totalorder (!%p382_p10), %s1698_s30, 79 }
  0x1a   : > { %s1868_s24 = sadd.s32 (!%p382_p10), 1, %s1698_s30  ;;  %p723_p11 = scmp.le.s32.totalorder (!%p382_p10), %s1698_s30, 79 }
  0x1b   : > { %p493_p5 = scmp.gt.s32.totalorder (!%p382_p10), %s1868_s24, 0  ;;  %p1361_p7 = scmp.lt.s32.totalorder (!%p382_p10), %s1868_s24, 79 }
  0x1c   : > { %v1371_v0 = vld [vmem:[%s2105_s3 + $0x4] sm:$0xf]  ;;  %vm552_vm0 = vcmask 1043456   ;;  %v597_v1 = vld [vmem:[%s2105_s3] sm:$0xf]  ;;  %v1716_v2 = vmov 0.0  }
  0x1d   : > { %1455 = vmatprep.subr.bf16.mxu0 %v1716_v2  ;;  %v554_v3 = vsel %vm552_vm0, %v1371_v0, 0  ;;  %1461 = vmatprep.subr.bf16.mxu1 %v1716_v2  ;;  %v599_v4 = vsel %vm552_vm0, %v597_v1, 0  ;;  %vm1717_vm1 = vmmov 0   ;;  %s462_s17 = scalar_select %p461_p12, %s1702_s9, 1  ;;  %v1878_v5 = vld [vmem:[%s2107_s5] ss:$0 sm:$0xff] }
  0x1e   : > { %1456 = vmatpush3.bf16.msra.mxu0 %v554_v3  ;;  %1462 = vmatpush3.bf16.msra.mxu1 %v599_v4  ;;  %s458_s20 = scalar_select %p457_p13, %s1849_s14, 0  ;;  %v1884_v9 = vld [vmem:[%s2108_s6] ss:$0 sm:$0xff]  ;;  %v1374_v12 = vld [vmem:[%s2105_s3 + $0x8] sm:$0xf]  ;;  %vm548_vm2 = vcmask 64512  }
  0x1f   : > { %1457 = vmatprep.mubr.msk.bf16.mxu0 %vm1717_vm1, %v1716_v2  ;;  %1463 = vmatprep.mubr.msk.bf16.mxu1 %vm1717_vm1, %v1716_v2  ;;  %s476_s21 = scalar_select %p475_p1, %s1698_s30, 0  ;;  %v1377_v13 = vld [vmem:[%s2105_s3 + $0x10] sm:$0xf]  ;;  %v645_v16 = vsel %vm552_vm0, %v1374_v12, 0  ;;  %v1379_v26 = vld [vmem:[%s2105_s3 + $0xc] sm:$0xf] }
  0x20   : > { %1467 = vmatprep.subr.bf16.mxu0 %v1716_v2  ;;  %1473 = vmatprep.subr.bf16.mxu1 %v1716_v2  ;;  %s2142_s20 = smov (!%p1347_p0, %s458_s20), 79  ;;  %s1865_s22 = smul.u32 160, %s462_s17  ;;  %v734_v19 = vsel %vm552_vm0, %v1377_v13, 0  ;;  %v1381_v27 = vld [vmem:[%s2105_s3 + $0x14] sm:$0xf]  ;;  %v780_v29 = vsel %vm552_vm0, %v1379_v26, 0 }
  0x21   : > { %p463_p2 = scmp.lt.s32.totalorder %s2142_s20, 79  ;;  %s2146_s21 = smov (!%p1354_p4, %s476_s21), 79  ;;  %v826_v30 = vsel %vm552_vm0, %v1381_v27, 0  ;;  %v1384_v34 = vld [vmem:[%s2105_s3 + $0x1c] sm:$0xf]  ;;  %vm690_vm3 = vcmask 1040384  }
  0x22   : > { %p481_p6 = scmp.lt.s32.totalorder %s2146_s21, 79  ;;  %v1386_v35 = vld [vmem:[%s2105_s3 + $0x18] sm:$0xf]  ;;  %v914_v38 = vsel %vm552_vm0, %v1384_v34, 0  ;;  %v1388_v42 = vld [vmem:[%s2105_s3 + $0x20] sm:$0xf] }
  0x23   : > { %s2144_s20 = smov (!%p463_p2, %s2142_s20), 79  ;;  %v960_v39 = vsel %vm552_vm0, %v1386_v35, 0  ;;  %v1006_v44 = vsel %vm552_vm0, %v1388_v42, 0  ;;  %p722_p10 = scmp.ge.s32.totalorder %s1698_s30, 0  ;;  %vm699_vm4 = vcmask 1046528  }
  0x24   : > { %s1352_s25 = sshll.u32 %s2144_s20, 1  ;;  %s2148_s21 = smov (!%p481_p6, %s2146_s21), 79 }
  0x25   : > { %s467_s26 = sadd.s32 %s1865_s22, %s1352_s25  ;;  %s1359_s25 = sshll.u32 %s2148_s21, 1 }
  0x26   : > { %s1353_s13 = sshll.u32 %s467_s26, 2  ;;  %p540_p12 = scmp.ge.s32.totalorder %s1849_s14, 0 }
  0x27   : > { %s469_s11 = scalar_lea.vmem %s2102_s0, %s1353_s13  ;;  %p541_p13 = scmp.le.s32.totalorder %s1849_s14, 79 }
  0x28   : > { %v1421_v6 = vld [vmem:[%s469_s11] sm:$0xff]   ;;  %s494_s23 = scalar_select %p493_p5, %s1868_s24, 0 }
  0x29   : > { %v1422_v7 = vunpack.c.l.bf16 %v1421_v6  ;;  %v1423_v8 = vunpack.c.h.bf16 %v1421_v6  ;;  %s485_s11 = sadd.s32 %s1865_s22, %s1359_s25  ;;  %p1971_p0 = pnand %p723_p11, %p722_p10 }
  0x2a   : > { %s1360_s13 = sshll.u32 %s485_s11, 2  ;;  %s2150_s23 = smov (!%p1361_p7, %s494_s23), 79 }
  0x2b   : > { %v528_v10 = vmul.f32 %v1422_v7, %v1878_v5  ;;  %v529_v11 = vmul.f32 %v1423_v8, %v1878_v5  ;;  %s487_s17 = scalar_lea.vmem %s2103_s1, %s1360_s13  ;;  %p499_p9 = scmp.lt.s32.totalorder %s2150_s23, 79 }
  0x2c   : > { %v1425_v17 = vld [vmem:[%s487_s17] sm:$0xff]   ;;  %p902_p1 = scmp.ge.s32.totalorder %s1868_s24, 0  ;;  %p903_p2 = scmp.le.s32.totalorder %s1868_s24, 79 }
  0x2d   : > { %v536_v14 = vadd.f32 %v1884_v9, %v528_v10  ;;  %v537_v15 = vadd.f32 %v1884_v9, %v529_v11  ;;  %v1426_v20 = vunpack.c.l.bf16 %v1425_v17  ;;  %v1427_v21 = vunpack.c.h.bf16 %v1425_v17  ;;  %s2152_s23 = smov (!%p499_p9, %s2150_s23), 79  ;;  %p1977_p4 = pnand %p541_p13, %p540_p12 }
  0x2e   : > { %s1366_s11 = sshll.u32 %s2152_s23, 1  ;;  %p1988_p5 = pnand %p903_p2, %p902_p1 }
  0x2f   : > { %v538_v18 = vpack.c.bf16 %v537_v15, %v536_v14  ;;  %v717_v22 = vmul.f32 %v1426_v20, %v1878_v5  ;;  %v718_v23 = vmul.f32 %v1427_v21, %v1878_v5  ;;  %s503_s16 = sadd.s32 %s1865_s22, %s1366_s11  ;;  %s2010_s23 = sand.u32 1, %s1690_s28  }
  0x30   : > { %s1367_s26 = sshll.u32 %s503_s16, 2  ;;  %s1510_s22 = smul.u32 160, %s1702_s9 }
  0x31   : > { %1458 = vmatmul.mubr.msk.bf16.vlgmr.msra.gmra.mxu0 %vm548_vm2, %v538_v18  ;;  %1464 = vmatmul.mubr.msk.bf16.vlgmr.msra.gmra.mxu1 %vm548_vm2, %v538_v18  ;;  %v719_v24 = vadd.f32 %v1884_v9, %v717_v22  ;;  %v720_v25 = vadd.f32 %v1884_v9, %v718_v23  ;;  %s505_s21 = scalar_lea.vmem %s2104_s2, %s1367_s26  ;;  %s1395_s17 = sshll.u32 %s1698_s30, 1 }
  0x32   : > { %1468 = vmatpush3.bf16.msra.mxu0 %v645_v16  ;;  %1474 = vmatpush3.bf16.msra.mxu1 %v734_v19  ;;  %v1429_v31 = vld [vmem:[%s505_s21] sm:$0xff]   ;;  %s1376_s14 = scalar_select %p1971_p0, 0, 1 }
  0x33   : > { %1469 = vmatprep.mubr.msk.bf16.mxu0 %vm1717_vm1, %v1716_v2  ;;  %1475 = vmatprep.mubr.msk.bf16.mxu1 %vm1717_vm1, %v1716_v2  ;;  %v721_v28 = vpack.c.bf16 %v720_v25, %v719_v24  ;;  %v1430_v32 = vunpack.c.l.bf16 %v1429_v31  ;;  %v1431_v33 = vunpack.c.h.bf16 %v1429_v31  ;;  %s1370_s26 = scalar_select %p1977_p4, 0, 1 }
  0x34   : > { %1479 = vmatprep.subr.bf16.mxu0 %v1716_v2  ;;  %1485 = vmatprep.subr.bf16.mxu1 %v1716_v2  ;;  %s727_s13 = scvt.s32.f32 %s1376_s14  ;;  %s1345_s20 = sshll.u32 %s2010_s23, 3 }
  0x35   : > { %v896_v36 = vmul.f32 %v1430_v32, %v1878_v5  ;;  %v897_v37 = vmul.f32 %v1431_v33, %v1878_v5  ;;  %s1383_s24 = scalar_select %p1988_p5, 0, 1 }
  0x36   : > { %s545_s29 = scvt.s32.f32 %s1370_s26  ;;  %s1131_s10 = sadd.s32 %s1510_s22, %s1395_s17 }
  0x37   : > { %v898_v40 = vadd.f32 %v1884_v9, %v896_v36  ;;  %v899_v41 = vadd.f32 %v1884_v9, %v897_v37  ;;  %s907_s21 = scvt.s32.f32 %s1383_s24  ;;  %s448_s11 = scalar_lea.vmem [#allocation2], %s1345_s20 }
  0x38   : > { %s1134_s14 = sshll.u32 %s448_s11, 4  ;;  %s1396_s16 = sshll.u32 %s1131_s10, 6  ;;  %s2018_s14 = int_to_ptr.vmem [resolvable:$true] %s1134_s14 }
  0x39   : > { %1470 = vmatmul.mubr.msk.bf16.vlgmr.msra.gmra.mxu0 %vm548_vm2, %v538_v18  ;;  %1476 = vmatmul.mubr.msk.bf16.vlgmr.msra.gmra.mxu1 %vm548_vm2, %v721_v28  ;;  %v900_v43 = vpack.c.bf16 %v899_v41, %v898_v40  ;;  %s2023_s24 = scalar_lea.hbm %s2109_s7, %s1396_s16  ;;  %s1718_s22 = smov [#allocation2]  }
  0x3a   : > { %1480 = vmatpush3.bf16.msra.mxu0 %v780_v29  ;;  %1486 = vmatpush3.bf16.msra.mxu1 %v826_v30  ;;  %s1596_s17 = sshll.u32 %s1718_s22, 4  ;;  %s1597_s17 = int_to_ptr.vmem [resolvable:$false] %s1596_s17 }
  0x3b   : > { %1481 = vmatprep.mubr.msk.bf16.mxu0 %vm1717_vm1, %v1716_v2  ;;  %1487 = vmatprep.mubr.msk.bf16.mxu1 %vm1717_vm1, %v1716_v2  ;;  %s1598_s20 = scalar_lea.vmem %s1597_s17, 256  ;;  %p1599_p10 = scmp.lt.s32.totalorder %s2018_s14, %s1597_s17 }
  0x3c   : > { %1491 = vmatprep.subr.bf16.mxu0 %v1716_v2  ;;  %1497 = vmatprep.subr.bf16.mxu1 %v1716_v2 }
  0x41   : > { %1482 = vmatmul.mubr.msk.bf16.vlgmr.msra.gmra.mxu0 %vm548_vm2, %v721_v28  ;;  %1488 = vmatmul.mubr.msk.bf16.vlgmr.msra.gmra.mxu1 %vm548_vm2, %v721_v28 }
  0x42   : > { %1492 = vmatpush3.bf16.msra.mxu0 %v914_v38  ;;  %1498 = vmatpush3.bf16.msra.mxu1 %v960_v39  ;;  %v889_v39 = vstv %s727_s13 }
  0x43   : > { %1493 = vmatprep.mubr.msk.bf16.mxu0 %vm1717_vm1, %v1716_v2  ;;  %1499 = vmatprep.mubr.msk.bf16.mxu1 %vm1717_vm1, %v1716_v2 }
  0x44   : > { %1503 = vmatprep.subr.bf16.mxu0 %v1716_v2 }
  0x49   : > { %1494 = vmatmul.mubr.msk.bf16.vlgmr.msra.gmra.mxu0 %vm548_vm2, %v900_v43  ;;  %1500 = vmatmul.mubr.msk.bf16.vlgmr.msra.gmra.mxu1 %vm548_vm2, %v900_v43 }
  0x4a   : > { %1504 = vmatpush3.bf16.msra.mxu0 %v1006_v44  ;;  %1505 = vmatprep.mubr.msk.bf16.mxu0 %vm1717_vm1, %v1716_v2 }
  0x51   : > { %1506 = vmatmul.mubr.msk.bf16.vlgmr.msra.gmra.mxu0 %vm548_vm2, %v900_v43 }
  0xf1   : > { %v1963_v45 = vpop.f32.mrf.mxu0  ;;  %v635_v46 = vpop.f32.mrf.mxu1 }
  0xf2   : > { %v691_v9 = vrot.slane %v635_v46, 7  ;;  %v710_v46 = vstv %s545_s29  ;;  %s1114_s29 = scalar_lea.sflag [#allocation3], %s2010_s23 }
  0xf3   : > { %v1459_v47 = vpop.f32.mrf.mxu0  ;;  %v1465_v48 = vpop.f32.mrf.mxu1 }
  0xf4   : > { %v696_v20 = vsel %vm690_vm3, 0.0, %v691_v9 }
  0xf5   : > { %v1965_v49 = vpop.f32.mrf.mxu0  ;;  %v638_v50 = vpop.f32.mrf.mxu1  ;;  %v706_v34 = vadd.f32 %v696_v20, %v1963_v45 }
  0xf6   : > { %v692_v10 = vrot.slane %v638_v50, 7 }
  0xf7   : > { %v1460_v51 = vpop.f32.mrf.mxu0  ;;  %v1466_v52 = vpop.f32.mrf.mxu1 }
  0xf8   : > { %v693_v21 = vsel %vm690_vm3, %v691_v9, %v692_v10 }
  0xf9   : > { %v681_v53 = vpop.f32.mrf.mxu0  ;;  %v770_v54 = vpop.f32.mrf.mxu1  ;;  %v707_v35 = vadd.f32 %v693_v21, %v1965_v49 }
  0xfa   : > { %v700_v22 = vrot.slane %v681_v53, 1 }
  0xfb   : > { %v1471_v55 = vpop.f32.mrf.mxu0  ;;  %v1477_v56 = vpop.f32.mrf.mxu1 }
  0xfc   : > { %v1069_v55 = vstv %s907_s21  ;;  %s1592_s21 = scalar_lea.vmem %s2018_s14, 128 }
  0xfd   : > { %v684_v57 = vpop.f32.mrf.mxu0  ;;  %v773_v58 = vpop.f32.mrf.mxu1  ;;  %p1593_p6 = scmp.ne.s32.totalorder %s2018_s14, %s1592_s21  ;;  %p1600_p11 = scmp.lt.s32.totalorder %s1598_s20, %s1592_s21 }
  0xfe   : > { %v701_v18 = vrot.slane %v684_v57, 1 }
  0xff   : > { %v1472_v59 = vpop.f32.mrf.mxu0  ;;  %v1478_v60 = vpop.f32.mrf.mxu1  ;;  %p1594_p7 = pnand %p1593_p6, %p1818_p3  ;;  %p1601_p12 = por %p1600_p11, %p1599_p10 }
 0x100   : > { %v702_v32 = vsel %vm699_vm4, %v700_v22, %v701_v18  ;;  %v705_v33 = vsel %vm699_vm4, %v701_v18, 0.0 }
 0x101   : > { %v816_v61 = vpop.f32.mrf.mxu0  ;;  %v862_v62 = vpop.f32.mrf.mxu1  ;;  %v708_v42 = vadd.f32 %v706_v34, %v702_v32  ;;  %v709_v43 = vadd.f32 %v707_v35, %v705_v33  ;;  %p1595_p9 = pneg %p1594_p7 }
 0x102   : > { %v871_v8 = vrot.slane %v816_v61, 7  ;;  %v879_v13 = vrot.slane %v862_v62, 1 }
 0x103   : > { %v1483_v63 = vpop.f32.mrf.mxu0  ;;  %v1489_v0 = vpop.f32.mrf.mxu1  ;;  %v711_v56 = vmul.f32 %v710_v46, %v708_v42  ;;  %v712_v57 = vmul.f32 %v710_v46, %v709_v43  ;;  %p1602_p13 = pnand %p1601_p12, %p1595_p9 }
 0x104   : > { %v876_v19 = vsel %vm690_vm3, 0.0, %v871_v8  ;;  %v1390_v0 = vld [vmem:[%s2106_s4] ss:$0 sm:$0xff] }
 0x105   : > { %v819_v1 = vpop.f32.mrf.mxu0  ;;  %v865_v2 = vpop.f32.mrf.mxu1  ;;  %v885_v30 = vadd.f32 %v876_v19, %v770_v54 }
 0x106   : > { %v872_v5 = vrot.slane %v819_v1, 7  ;;  %v880_v15 = vrot.slane %v865_v2, 1 }
 0x107   : > { %v1484_v3 = vpop.f32.mrf.mxu0  ;;  %v1490_v4 = vpop.f32.mrf.mxu1 }
 0x108   : > { %v873_v14 = vsel %vm690_vm3, %v871_v8, %v872_v5  ;;  %v881_v26 = vsel %vm699_vm4, %v879_v13, %v880_v15  ;;  %v884_v27 = vsel %vm699_vm4, %v880_v15, 0.0 }
 0x109   : > { %v950_v6 = vpop.f32.mrf.mxu0  ;;  %v996_v7 = vpop.f32.mrf.mxu1  ;;  %v886_v23 = vadd.f32 %v873_v14, %v773_v58  ;;  %v887_v36 = vadd.f32 %v885_v30, %v881_v26 }
 0x10a   : > { %v1051_v28 = vrot.slane %v996_v7, 7 }
 0x10b   : > { %v1495_v11 = vpop.f32.mrf.mxu0  ;;  %v1501_v12 = vpop.f32.mrf.mxu1  ;;  %v888_v37 = vadd.f32 %v886_v23, %v884_v27  ;;  %v890_v48 = vmul.f32 %v889_v39, %v887_v36 }
 0x10c   : > { %v1056_v40 = vsel %vm690_vm3, 0.0, %v1051_v28 }
 0x10d   : > { %v953_v16 = vpop.f32.mrf.mxu0  ;;  %v999_v17 = vpop.f32.mrf.mxu1  ;;  %v891_v49 = vmul.f32 %v889_v39, %v888_v37  ;;  %v1065_v50 = vadd.f32 %v1056_v40, %v950_v6  ;;  %v892_v60 = vadd.f32 %v890_v48, %v711_v56 }
 0x10e   : > { %v1052_v29 = vrot.slane %v999_v17, 7 }
 0x10f   : > { %v1496_v24 = vpop.f32.mrf.mxu0  ;;  %v1502_v25 = vpop.f32.mrf.mxu1  ;;  %v893_v61 = vadd.f32 %v891_v49, %v712_v57 }
 0x110   : > { %v1053_v41 = vsel %vm690_vm3, %v1051_v28, %v1052_v29 }
 0x111   : > { %v1042_v31 = vpop.f32.mrf.mxu0  ;;  %v1066_v51 = vadd.f32 %v1053_v41, %v953_v16 }
 0x112   : > { %v1059_v47 = vrot.slane %v1042_v31, 1 }
 0x113   : > { %v1507_v38 = vpop.f32.mrf.mxu0 }
 0x115   : > { %v1045_v44 = vpop.f32.mrf.mxu0 }
 0x116   : > { %v1060_v45 = vrot.slane %v1045_v44, 1 }
 0x117   : > { %v1508_v52 = vpop.f32.mrf.mxu0 }
 0x118   : > { %v1061_v53 = vsel %vm699_vm4, %v1059_v47, %v1060_v45  ;;  %v1064_v54 = vsel %vm699_vm4, %v1060_v45, 0.0 }
 0x119   : > { %v1067_v58 = vadd.f32 %v1065_v50, %v1061_v53  ;;  %v1068_v59 = vadd.f32 %v1066_v51, %v1064_v54 }
 0x11b   : > { %v1070_v62 = vmul.f32 %v1069_v55, %v1067_v58  ;;  %v1071_v63 = vmul.f32 %v1069_v55, %v1068_v59 }
 0x11d   : > { %v1072_v1 = vadd.f32 %v1070_v62, %v892_v60  ;;  %v1073_v2 = vadd.f32 %v1071_v63, %v893_v61 }
 0x11f   : > { %v1081_v3 = vadd.f32 %v1390_v0, %v1072_v1  ;;  %v1082_v4 = vadd.f32 %v1390_v0, %v1073_v2 }
 0x121   : > { %v1083_v5 = vmax.f32 %v1081_v3, 0.0  ;;  %v1084_v6 = vmax.f32 %v1082_v4, 0.0 }
 0x123   : > { %v1095_v7 = vadd.f32 %v1084_v6, %v1083_v5  ;;  %v1102_v8 = vmul.f32 %v1083_v5, %v1083_v5  ;;  %v1103_v9 = vmul.f32 %v1084_v6, %v1084_v6  ;;  %v1435_v10 = vpack.c.bf16 %v1084_v6, %v1083_v5 }
 0x125   : > { %1436 = vst [vmem:[%s448_s11] sm:$0xff] %v1435_v10   ;;  %v1096_v11 = vrot.slane %v1095_v7, 4  ;;  %v1104_v12 = vadd.f32 %v1103_v9, %v1102_v8 }
 0x126   : > { %1605 = shalt.err (!%p1602_p13)
}
 0x127   : > { %s1606_s25 = scalar_lea.hbm %s2023_s24, 128  ;;  %s1610_s11 = scalar_lea.hbm %s2109_s7, 20480 }
 0x128   : > { %p1607_p0 = scmp.ne.s32.totalorder %s2023_s24, %s1606_s25  ;;  %p1611_p4 = scmp.lt.s32.totalorder %s2023_s24, %s2109_s7 }
 0x129   : > { %p1612_p5 = scmp.lt.s32.totalorder %s1610_s11, %s1606_s25 }
 0x12a   : > { %p1608_p1 = pnand %p1607_p0, %p1818_p3 }
 0x12b   : > { %p1613_p6 = por %p1612_p5, %p1611_p4 }
 0x12c   : > { %p1609_p2 = pneg %p1608_p1 }
 0x12e   : > { %p1614_p7 = pnand %p1613_p6, %p1609_p2 }
 0x130   : > { %1617 = shalt.err (!%p1614_p7)
}
 0x131   : > { %s1719_s13 = smov 64   ;;  %s1720_s21 = smov 4   ;;  %v1097_v13 = vadd.f32 %v1096_v11, %v1095_v7  ;;  %v1105_v14 = vrot.slane %v1104_v12, 4 }
 0x132   : > { %1512 = dma.vmem_to_hbm [thread:$0]  (%p1818_p3), %s2018_s14, 128, %s2023_s24, %s1114_s29, %s1719_s13, %s1719_s13, %s1720_s21  }
 0x133   : > { %s1511_s22 = smul.u32 80, %s1702_s9  ;;  %s1346_s17 = sshll.u32 %s2010_s23, 1  ;;  %v1098_v15 = vrot.slane %v1097_v13, 2  ;;  %v1106_v16 = vadd.f32 %v1105_v14, %v1104_v12 }
 0x134   : > { %s455_s15 = scalar_lea.vmem [#allocation4], %s1346_s17  ;;  %s1119_s29 = scalar_lea.sflag [#allocation5], %s2010_s23 }
 0x135   : > { %v1099_v17 = vadd.f32 %v1098_v15, %v1097_v13  ;;  %v1107_v18 = vrot.slane %v1106_v16, 2  ;;  %s1148_s20 = sadd.s32 %s1698_s30, %s1511_s22  ;;  %s1152_s10 = sshll.u32 %s455_s15, 4  ;;  %s1153_s10 = int_to_ptr.vmem [resolvable:$true] %s1152_s10 }
 0x136   : > { %s1397_s25 = sshll.u32 %s1148_s20, 5  ;;  %s1618_s30 = scalar_lea.vmem %s1153_s10, 32 }
 0x137   : > { %v1100_v19 = vrot.slane %v1099_v17, 1  ;;  %v1108_v20 = vadd.f32 %v1107_v18, %v1106_v16  ;;  %s2054_s9 = scalar_lea.hbm %s2110_s8, %s1397_s25  ;;  %p1619_p9 = scmp.ne.s32.totalorder %s1153_s10, %s1618_s30 }
 0x138   : > { %s1721_s11 = smov [#allocation4]  }
 0x139   : > { %v1109_v21 = vrot.slane %v1108_v20, 1  ;;  %v1101_v22 = vadd.f32 %v1100_v19, %v1099_v17  ;;  %p1620_p10 = pnand %p1619_p9, %p1818_p3  ;;  %s1622_s16 = sshll.u32 %s1721_s11, 4  ;;  %s1623_s16 = int_to_ptr.vmem [resolvable:$false] %s1622_s16 }
 0x13a   : > { %s1624_s26 = scalar_lea.vmem %s1623_s16, 64  ;;  %p1625_p12 = scmp.lt.s32.totalorder %s1153_s10, %s1623_s16 }
 0x13b   : > { %v1110_v23 = vadd.f32 %v1109_v21, %v1108_v20  ;;  %p1621_p11 = pneg %p1620_p10  ;;  %p1626_p13 = scmp.lt.s32.totalorder %s1624_s26, %s1618_s30 }
 0x13d   : > { %v1111_v24 = vsel %vm690_vm3, %v1101_v22, %v1110_v23  ;;  %p1627_p0 = por %p1626_p13, %p1625_p12 }
 0x13e   : > { %1112 = vst [vmem:[%s455_s15] sm:$0x3] %v1111_v24 }
 0x13f   : > { %p1628_p1 = pnand %p1627_p0, %p1621_p11 }
 0x141   : > { %1631 = shalt.err (!%p1628_p1)
}
 0x142   : > { %s1632_s13 = scalar_lea.hbm %s2054_s9, 32  ;;  %s1636_s22 = scalar_lea.hbm %s2110_s8, 5120 }
 0x143   : > { %p1633_p2 = scmp.ne.s32.totalorder %s2054_s9, %s1632_s13  ;;  %p1637_p6 = scmp.lt.s32.totalorder %s2054_s9, %s2110_s8 }
 0x144   : > { %p1638_p7 = scmp.lt.s32.totalorder %s1636_s22, %s1632_s13 }
 0x145   : > { %p1634_p4 = pnand %p1633_p2, %p1818_p3 }
 0x146   : > { %p1639_p9 = por %p1638_p7, %p1637_p6 }
 0x147   : > { %p1635_p5 = pneg %p1634_p4 }
 0x149   : > { %p1640_p10 = pnand %p1639_p9, %p1635_p5 }
 0x14b   : > { %1643 = shalt.err (!%p1640_p10)
}
 0x14c   : > { %1513 = dma.vmem_to_hbm [thread:$0]  (%p1818_p3), %s1153_s10, 32, %s2054_s9, %s1119_s29  }
 0x14d PF: > { %p1523_p11 = scmp.ge.s32.totalorder %s1714_s12, 2  ;;  %s1164_s25 = sand.u32 1, %s1686_s27  }
 0x14e   : > { %s1165_s15 = scalar_lea.sflag [#allocation3], %s1164_s25 }
 0x14f   : > { %p1517_p12 = pnand %p1523_p11, %p1827_p8 }
 0x151   : > { %p1518_p13 = pneg %p1517_p12 }
 0x153   : > { %1677 = dma.done.wait (%p1518_p13), %s1165_s15, 128  }
 0x154   : > { %1679 = vsyncadd (%p1518_p13), %s1165_s15, 4294967168  ;;  %s1174_s14 = scalar_lea.sflag [#allocation5], %s1164_s25 }
 0x155   : > { %1681 = dma.done.wait (%p1518_p13), %s1174_s14, 32  }
 0x156   : > { %1683 = vsyncadd (%p1518_p13), %s1174_s14, 4294967264  ;;  %s25_s12 = sadd.s32 1, %s1714_s12   ;;  %s2127_s18 = sld [smem:[#allocation8_spill]] }
 0x157   : > { %p22_p0 = scmp.ge.s32.totalorder %s25_s12, 162   ;;  %s2128_s29 = sld [smem:[#allocation13_spill]] }
 0x158   : > { %s2129_s30 = sld [smem:[#allocation9_spill]]  ;;  %s2133_s27 = smov %s1690_s28 }
 0x159   : > { %s2130_s9 = sld [smem:[#allocation10_spill]]  ;;  %24 = sbr.rel (!%p22_p0) target bundleno = 7 (0x7), region = 114 }
 0x15a   : > { %s2131_s10 = sld [smem:[#allocation11_spill]] }
 0x15b   : > { %s2132_s11 = sld [smem:[#allocation12_spill]] }
 0x15c   : > { %s2134_s28 = smov %s2127_s18 }
 0x15e   :  { %1179 = vsyncpa [#allocation3], 1 }
 0x15f   :  { %1181 = vsyncpa [#allocation3 + $0x1], 1 }
 0x160   :  { %1182 = vsyncpa [#allocation5], 1 }
 0x161   :  { %1184 = vsyncpa [#allocation5 + $0x1], 1 }

</bundles_post_ra>
